<compile_context>
chip_gen: v6e
topology: v6e:2x2x1
jax: 0.10.0
libtpu: 0.0.40
codegen_flags: <defaults>
</compile_context>

<pallas_src>
import functools

import numpy as np
import jax
import jax.numpy as jnp
from jax.experimental import pallas as pl
from jax.experimental.pallas import tpu as pltpu


def _round_up(x, m):
    return ((x + m - 1) // m) * m


def _constraints_kernel(scores_ref, d_ref, hk_ref, acc_ref, *, inv_b):
    """One batch tile: accumulate sum_b relu(scores @ D) into acc_ref.

    scores_ref: [B_tile, C_pad]   d_ref: [C_pad, K_pad]
    hk_ref:     [1, K_pad]        acc_ref (scratch): [1, K_pad] f32
    """
    i = pl.program_id(0)

    @pl.when(i == 0)
    def _():
        acc_ref[...] = jnp.zeros_like(acc_ref)

    # child_score - parent_score for every constraint, for every batch row.
    diff = jnp.dot(scores_ref[...], d_ref[...],
                   preferred_element_type=jnp.float32)          # [B_tile, K_pad] f32
    h = jnp.maximum(diff, 0.0)                                  # hinge penalty  <- TODO(synk) hook
    acc_ref[...] += jnp.sum(h, axis=0, keepdims=True)           # per-constraint partial sum

    @pl.when(i == pl.num_programs(0) - 1)
    def _():
        # Divide by the *true* batch size (not the padded/tile size).
        hk_ref[...] = acc_ref[...] * inv_b


def constraints_forward(scores, d_mat, lambda_param, weight,
                        *, input_dtype=jnp.float32,
                        vmem_budget_bytes=24 * 1024 * 1024):
    """scores: [B, C]; d_mat: [C, K]; lambda_param: [K]; weight: scalar.

    Returns (loss, h_k) matching Constraints.forward.
    Set input_dtype=jnp.bfloat16 on v6e/v7x to halve HBM traffic (D's +-1/0
    entries are exact in bf16); accumulation stays f32.
    """
    B, C = scores.shape
    Cd, K = d_mat.shape
    assert Cd == C, (Cd, C)

    # Lane-dense padding: last dims to multiples of 128.
    C_pad = _round_up(max(C, 128), 128)
    K_pad = _round_up(max(K, 128), 128)

    bytes_per_elem = jnp.dtype(input_dtype).itemsize

    # Batch tile: largest multiple of 8 whose double-buffered scores stream
    # fits the VMEM budget (keeps the kernel safe on v7x's 64 MiB VMEM).
    max_rows = max(8, (vmem_budget_bytes // (2 * C_pad * bytes_per_elem)) // 8 * 8)
    B_tile = int(min(_round_up(B, 8), max_rows, 1024))
    B_pad = _round_up(B, B_tile)
    num_tiles = B_pad // B_tile

    # Zero-pad: padded score rows / D columns contribute relu(0) = 0.
    scores_p = jnp.zeros((B_pad, C_pad), input_dtype).at[:B, :C].set(
        scores.astype(input_dtype))
    d_p = jnp.zeros((C_pad, K_pad), input_dtype).at[:C, :K].set(
        d_mat.astype(input_dtype))

    kernel = functools.partial(_constraints_kernel, inv_b=1.0 / float(B))

    cost = pl.CostEstimate(
        flops=2 * B_pad * C_pad * K_pad,
        transcendentals=0,
        bytes_accessed=bytes_per_elem * (B_pad * C_pad + C_pad * K_pad) + 4 * K_pad,
    )

    # Explicit VMEM limit: double-buffered scores + D + output + scratch + headroom.
    vmem_bytes = (2 * B_tile * C_pad * bytes_per_elem
                  + 2 * C_pad * K_pad * bytes_per_elem
                  + 2 * K_pad * 4
                  + K_pad * 4
                  + (2 << 20))
    vmem_limit = int(min(100 * 1024 * 1024, max(vmem_bytes, 16 * 1024 * 1024)))

    h_k_padded = pl.pallas_call(
        kernel,
        out_shape=jax.ShapeDtypeStruct((1, K_pad), jnp.float32),
        grid_spec=pltpu.PrefetchScalarGridSpec(
            num_scalar_prefetch=0,
            grid=(num_tiles,),
            in_specs=[
                pl.BlockSpec((B_tile, C_pad), lambda i: (i, 0)),   # streamed over B
                pl.BlockSpec((C_pad, K_pad), lambda i: (0, 0)),    # D stays resident
            ],
            out_specs=pl.BlockSpec((1, K_pad), lambda i: (0, 0)),  # resident accumulator output
            scratch_shapes=[pltpu.VMEM((1, K_pad), jnp.float32)],
        ),
        compiler_params=pltpu.CompilerParams(
            dimension_semantics=("arbitrary",),   # B axis is a reduction
            vmem_limit_bytes=vmem_limit,
        ),
        cost_estimate=cost,
    )(scores_p, d_p)

    h_k = h_k_padded[0, :K]
    # Cheap scalar epilogue in the wrapper (XLA fuses it with surrounding ops).
    loss = jnp.asarray(weight, jnp.float32) * jnp.sum(
        lambda_param.astype(jnp.float32) * h_k)
    return loss, h_k


def build_implication_matrix(ontology, class_to_idx):
    """Return D [C, K] with +1 at child index, -1 at parent index per constraint."""
    num_classes = len(class_to_idx)
    cols = []
    for parent, children in ontology.items():
        p = class_to_idx[parent]
        for child in children:
            c = class_to_idx[child]
            col = [0.0] * num_classes
            col[c] += 1.0
            col[p] -= 1.0
            cols.append(col)
    return jnp.asarray(np.asarray(cols, dtype="float32").T)  # [C, K]


if __name__ == "__main__":
    # Small deterministic setup consistent with the module's constructor.
    ontology = {
        "animal": ["dog", "cat", "bird"],
        "vehicle": ["car", "bus", "bike", "train"],
    }
    classes = ["animal", "vehicle", "dog", "cat", "bird", "car", "bus", "bike", "train"]
    class_to_idx = {name: i for i, name in enumerate(classes)}

    num_constraints = sum(len(v) for v in ontology.values())   # 7
    B, C = 8, len(classes)                                     # scores: [8, 9]

    key = jax.random.PRNGKey(0)
    k_scores, k_lam = jax.random.split(key)
    scores = jax.random.normal(k_scores, (B, C), dtype=jnp.float32)

    # lambda is nn.Parameter(zeros) at init; use a nonzero value here so the
    # loss check is non-trivial (forward semantics hold for any value).
    lambda_param = jax.random.normal(k_lam, (num_constraints,), dtype=jnp.float32)
    weight = 1.0  # Implication.weight

    d_mat = build_implication_matrix(ontology, class_to_idx)   # [C, K]

    loss, h_k = constraints_forward(scores, d_mat, lambda_param, weight)
    jax.block_until_ready((loss, h_k))

    # Reference check in plain JAX.
    diff = scores @ d_mat
    h_ref = jnp.mean(jnp.maximum(diff, 0.0), axis=0)
    loss_ref = weight * jnp.sum(lambda_param * h_ref)
    assert jnp.allclose(h_k, h_ref, atol=1e-5), (h_k, h_ref)
    assert jnp.allclose(loss, loss_ref, atol=1e-5), (loss, loss_ref)

    # Second check: batch size not a multiple of the tile (exercises zero padding).
    B2 = 13
    scores2 = jax.random.normal(jax.random.PRNGKey(1), (B2, C), dtype=jnp.float32)
    loss2, h_k2 = constraints_forward(scores2, d_mat, lambda_param, weight)
    jax.block_until_ready((loss2, h_k2))
    h_ref2 = jnp.mean(jnp.maximum(scores2 @ d_mat, 0.0), axis=0)
    loss_ref2 = weight * jnp.sum(lambda_param * h_ref2)
    assert jnp.allclose(h_k2, h_ref2, atol=1e-5), (h_k2, h_ref2)
    assert jnp.allclose(loss2, loss_ref2, atol=1e-5), (loss2, loss_ref2)

    print("KERNEL_OK")
</pallas_src>

<mosaic_0001>
module attributes {stable_mosaic.version = 11 : i64} {
  func.func @_constraints_kernel(%arg0: i32, %arg1: memref<8x128xf32, #tpu.memory_space<vmem>>, %arg2: memref<128x128xf32, #tpu.memory_space<vmem>>, %arg3: memref<1x128xf32, #tpu.memory_space<vmem>>, %arg4: memref<1x128xf32, #tpu.memory_space<vmem>>) attributes {dimension_semantics = [#tpu.dimension_semantics<arbitrary>], iteration_bounds = array<i64: 1>, scalar_prefetch = 0 : i64, scratch_operands = 1 : i64, tpu.core_type = #tpu.core_type<tc>, window_params = [{transform_indices = @transform_0, window_bounds = array<i64: 8, 128>}, {pipeline_mode = #tpu.pipeline_mode<synchronous>, transform_indices = @transform_1, window_bounds = array<i64: 128, 128>}, {pipeline_mode = #tpu.pipeline_mode<synchronous>, transform_indices = @transform_2, window_bounds = array<i64: 1, 128>}]} {
    %c0_i32 = arith.constant 0 : i32
    %0 = arith.cmpi eq, %arg0, %c0_i32 : i32
    %1 = arith.extui %0 : i1 to i32
    %c0_i32_0 = arith.constant 0 : i32
    %2 = arith.cmpi ne, %1, %c0_i32_0 : i32
    scf.if %2 {
      %cst_12 = arith.constant 0.000000e+00 : f32
      %16 = vector.broadcast %cst_12 : f32 to vector<1x128xf32>
      %c0_13 = arith.constant 0 : index
      %c0_14 = arith.constant 0 : index
      %17 = vector.load %arg4[%c0_13, %c0_14] : memref<1x128xf32, #tpu.memory_space<vmem>>, vector<1x128xf32>
      tpu.vector_store %arg4[%c0_13, %c0_14], %16 {strides = array<i32>} : memref<1x128xf32, #tpu.memory_space<vmem>>, vector<1x128xf32>,
    } else {
    }
    %c0 = arith.constant 0 : index
    %c0_1 = arith.constant 0 : index
    %3 = vector.load %arg1[%c0, %c0_1] : memref<8x128xf32, #tpu.memory_space<vmem>>, vector<8x128xf32>
    %c0_2 = arith.constant 0 : index
    %c0_3 = arith.constant 0 : index
    %4 = vector.load %arg2[%c0_2, %c0_3] : memref<128x128xf32, #tpu.memory_space<vmem>>, vector<128x128xf32>
    %cst = arith.constant dense<0.000000e+00> : vector<8x128xf32>
    %5 = tpu.matmul %3, %4, %cst {dimension_numbers = #tpu.dot_dimension_numbers<[1], [0], [0], [1], [0, 0, 1, 1], [], []>} : vector<8x128xf32>, vector<128x128xf32>, vector<8x128xf32> -> vector<8x128xf32>
    %cst_4 = arith.constant 0.000000e+00 : f32
    %6 = vector.broadcast %cst_4 : f32 to vector<8x128xf32>
    %7 = arith.maximumf %5, %6 : vector<8x128xf32>
    %c0_5 = arith.constant 0 : index
    %c0_6 = arith.constant 0 : index
    %8 = vector.load %arg4[%c0_5, %c0_6] : memref<1x128xf32, #tpu.memory_space<vmem>>, vector<1x128xf32>
    %cst_7 = arith.constant dense<0.000000e+00> : vector<128xf32>
    %9 = vector.multi_reduction <add>, %7, %cst_7 [0] : vector<8x128xf32> to vector<128xf32>
    %10 = vector.shape_cast %9 : vector<128xf32> to vector<1x128xf32>
    %11 = arith.addf %8, %10 : vector<1x128xf32>
    %c0_8 = arith.constant 0 : index
    %c0_9 = arith.constant 0 : index
    %12 = vector.load %arg4[%c0_8, %c0_9] : memref<1x128xf32, #tpu.memory_space<vmem>>, vector<1x128xf32>
    tpu.vector_store %arg4[%c0_8, %c0_9], %11 {strides = array<i32>} : memref<1x128xf32, #tpu.memory_space<vmem>>, vector<1x128xf32>,
    %c0_i32_10 = arith.constant 0 : i32
    %13 = arith.cmpi eq, %arg0, %c0_i32_10 : i32
    %14 = arith.extui %13 : i1 to i32
    %c0_i32_11 = arith.constant 0 : i32
    %15 = arith.cmpi ne, %14, %c0_i32_11 : i32
    scf.if %15 {
      %c0_12 = arith.constant 0 : index
      %c0_13 = arith.constant 0 : index
      %16 = vector.load %arg4[%c0_12, %c0_13] : memref<1x128xf32, #tpu.memory_space<vmem>>, vector<1x128xf32>
      %cst_14 = arith.constant 1.250000e-01 : f32
      %17 = vector.broadcast %cst_14 : f32 to vector<1x128xf32>
      %18 = arith.mulf %16, %17 : vector<1x128xf32>
      %c0_15 = arith.constant 0 : index
      %c0_16 = arith.constant 0 : index
      %19 = vector.load %arg3[%c0_15, %c0_16] : memref<1x128xf32, #tpu.memory_space<vmem>>, vector<1x128xf32>
      tpu.vector_store %arg3[%c0_15, %c0_16], %18 {strides = array<i32>} : memref<1x128xf32, #tpu.memory_space<vmem>>, vector<1x128xf32>,
    } else {
    }
    return
  }
  func.func @transform_0(%arg0: i32) -> (i32, i32) {
    %c0_i32 = arith.constant 0 : i32
    %c0_i32_0 = arith.constant 0 : i32
    return %arg0, %c0_i32 : i32, i32
  }
  func.func @transform_1(%arg0: i32) -> (i32, i32) {
    %c0_i32 = arith.constant 0 : i32
    %c0_i32_0 = arith.constant 0 : i32
    %c0_i32_1 = arith.constant 0 : i32
    return %c0_i32, %c0_i32_0 : i32, i32
  }
  func.func @transform_2(%arg0: i32) -> (i32, i32) {
    %c0_i32 = arith.constant 0 : i32
    %c0_i32_0 = arith.constant 0 : i32
    %c0_i32_1 = arith.constant 0 : i32
    return %c0_i32, %c0_i32_0 : i32, i32
  }
}

</mosaic_0001>

<bundles_post_ra>
// kernel: tpu_custom_call.1
= control target key start
LH: loop header
LB: loop body
LE: loop exit
PB: predicated region body
PF: predicated region fallthrough
CT: control target
= control target key end

     0   :  { %7 = vsyncpa [#allocation4], 0  ;;  %s318_s0 = inlined_call_operand.hbm [shape: f32[8,128], index: 0, kind: input, shape index: {}]   ;;  %s319_s1 = inlined_call_operand.hbm [shape: f32[128,128], index: 1, kind: input, shape index: {}]   ;;  %s320_s2 = inlined_call_operand.hbm [shape: f32[1,128], index: 2, kind: output, shape index: {}]  }
   0x1   :  { %8 = vsyncpa [#allocation7], 0 }
   0x2   :  { %9 = vsyncpa [#allocation5], 0  ;;  %s287_s9 = smov [#allocation3]   ;;  %s288_s11 = smov [#allocation6]  }
   0x3   :  { %s16_s10 = sshll.u32 %s287_s9, 4  ;;  %s25_s12 = sshll.u32 %s288_s11, 4  ;;  %s17_s10 = int_to_ptr.vmem [resolvable:$true] %s16_s10  ;;  %s26_s12 = int_to_ptr.vmem [resolvable:$true] %s25_s12 }
   0x4   :  { %s229_s13 = scalar_lea.vmem %s17_s10, 128  ;;  %p234_p1 = scmp.lt.s32.totalorder %s17_s10, %s17_s10 }
   0x5   :  { %p230_p0 = scmp.ne.s32.totalorder %s17_s10, %s229_s13  ;;  %p235_p2 = scmp.lt.s32.totalorder %s229_s13, %s229_s13 }
   0x7   :  { %p236_p3 = por %p235_p2, %p234_p1 }
   0x9   :  { %p237_p4 = pnand %p236_p3, %p230_p0 }
   0xb   :  { %240 = shalt.err (!%p237_p4)
}
   0xc   :  { %19 = dma.hbm_to_vmem [thread:$0]  %s318_s0, 128, %s17_s10, [#allocation4]  }
   0xd   :  { %s249_s16 = scalar_lea.vmem %s26_s12, 2048  ;;  %p254_p6 = scmp.lt.s32.totalorder %s26_s12, %s26_s12 }
   0xe   :  { %p250_p5 = scmp.ne.s32.totalorder %s26_s12, %s249_s16  ;;  %p255_p7 = scmp.lt.s32.totalorder %s249_s16, %s249_s16 }
  0x10   :  { %p256_p8 = por %p255_p7, %p254_p6 }
  0x12   :  { %p257_p9 = pnand %p256_p8, %p250_p5 }
  0x14   :  { %260 = shalt.err (!%p257_p9)
}
  0x15   :  { %s289_s17 = smov 128   ;;  %s290_s18 = smov 8  }
  0x16   :  { %31 = dma.hbm_to_vmem [thread:$0]  %s319_s1, 2048, %s26_s12, [#allocation7], %s289_s17, %s289_s17, %s290_s18  }
  0x17   :  { %281 = dma.done.wait [#allocation4], 128  }
  0x18   :  { %282 = vsyncadd [#allocation4], 4294967168 }
  0x19   :  { %283 = dma.done.wait [#allocation7], 2048  }
  0x1a   :  { %284 = vsyncadd [#allocation7], 4294965248  ;;  %v291_v0 = vmov 0.0   ;;  %vm292_vm0 = vmmov 0   ;;  %v59_v1 = vld [vmem:[#allocation6 + $0x78] sm:$0xff]  ;;  %v58_v2 = vld [vmem:[#allocation6 + $0x70] sm:$0xff] }
  0x1b   :  { %179 = vmatprep.subr.mxu0 %v291_v0  ;;  %42 = vst [vmem:[#allocation2] sm:$0x1] %v291_v0  ;;  %211 = vmatprep.mubr.msk.f32.mxu0 %vm292_vm0, %v291_v0  ;;  %v57_v3 = vld [vmem:[#allocation6 + $0x68] sm:$0xff]  ;;  %v56_v4 = vld [vmem:[#allocation6 + $0x60] sm:$0xff]  ;;  %v55_v5 = vld [vmem:[#allocation6 + $0x58] sm:$0xff]  ;;  %s293_s0 = smov [#allocation8]  }
  0x1c   :  { %180 = vmatpush3.msra.mxu0 %v59_v1  ;;  %v54_v6 = vld [vmem:[#allocation6 + $0x50] sm:$0xff]  ;;  %v53_v7 = vld [vmem:[#allocation6 + $0x48] sm:$0xff]  ;;  %v52_v8 = vld [vmem:[#allocation6 + $0x40] sm:$0xff]  ;;  %s152_s1 = sshll.u32 %s293_s0, 4  ;;  %s153_s1 = int_to_ptr.vmem [resolvable:$true] %s152_s1 }
  0x1d   :  { %181 = vmatprep.subr.mxu0 %v291_v0  ;;  %v51_v9 = vld [vmem:[#allocation6 + $0x38] sm:$0xff]  ;;  %v50_v10 = vld [vmem:[#allocation6 + $0x30] sm:$0xff]  ;;  %v49_v11 = vld [vmem:[#allocation6 + $0x28] sm:$0xff]  ;;  %s261_s21 = scalar_lea.vmem %s153_s1, 16  ;;  %s265_s22 = scalar_lea.vmem %s153_s1, 32 }
  0x1e   :  { %182 = vmatpush3.msra.mxu0 %v58_v2  ;;  %v48_v12 = vld [vmem:[#allocation6 + $0x20] sm:$0xff]  ;;  %v47_v13 = vld [vmem:[#allocation6 + $0x18] sm:$0xff]  ;;  %v46_v14 = vld [vmem:[#allocation6 + $0x10] sm:$0xff]  ;;  %p262_p10 = scmp.ne.s32.totalorder %s153_s1, %s261_s21  ;;  %p266_p11 = scmp.lt.s32.totalorder %s153_s1, %s153_s1 }
  0x1f   :  { %183 = vmatprep.subr.mxu0 %v291_v0  ;;  %v45_v15 = vld [vmem:[#allocation6 + $0x8] sm:$0xff]  ;;  %v44_v16 = vld [vmem:[#allocation6] sm:$0xff]  ;;  %v43_v17 = vld [vmem:[#allocation3] sm:$0xff]  ;;  %p267_p12 = scmp.lt.s32.totalorder %s265_s22, %s261_s21 }
  0x20   :  { %184 = vmatpush3.msra.mxu0 %v57_v3 }
  0x21   :  { %185 = vmatprep.subr.mxu0 %v291_v0  ;;  %p268_p13 = por %p267_p12, %p266_p11 }
  0x22   :  { %186 = vmatpush3.msra.mxu0 %v56_v4  ;;  %v131_v26 = vld [vmem:[#allocation2] sm:$0x1] }
  0x23   :  { %187 = vmatprep.subr.mxu0 %v291_v0  ;;  %p269_p0 = pnand %p268_p13, %p262_p10 }
  0x24   :  { %188 = vmatpush3.msra.mxu0 %v55_v5 }
  0x25   :  { %189 = vmatprep.subr.mxu0 %v291_v0 }
  0x26   :  { %190 = vmatpush3.msra.mxu0 %v54_v6 }
  0x27   :  { %191 = vmatprep.subr.mxu0 %v291_v0 }
  0x28   :  { %192 = vmatpush3.msra.mxu0 %v53_v7 }
  0x29   :  { %193 = vmatprep.subr.mxu0 %v291_v0 }
  0x2a   :  { %194 = vmatpush3.msra.mxu0 %v52_v8 }
  0x2b   :  { %195 = vmatprep.subr.mxu0 %v291_v0 }
  0x2c   :  { %196 = vmatpush3.msra.mxu0 %v51_v9 }
  0x2d   :  { %197 = vmatprep.subr.mxu0 %v291_v0 }
  0x2e   :  { %198 = vmatpush3.msra.mxu0 %v50_v10 }
  0x2f   :  { %199 = vmatprep.subr.mxu0 %v291_v0 }
  0x30   :  { %200 = vmatpush3.msra.mxu0 %v49_v11 }
  0x31   :  { %201 = vmatprep.subr.mxu0 %v291_v0 }
  0x32   :  { %202 = vmatpush3.msra.mxu0 %v48_v12 }
  0x33   :  { %203 = vmatprep.subr.mxu0 %v291_v0 }
  0x34   :  { %204 = vmatpush3.msra.mxu0 %v47_v13 }
  0x35   :  { %205 = vmatprep.subr.mxu0 %v291_v0 }
  0x36   :  { %206 = vmatpush3.msra.mxu0 %v46_v14 }
  0x37   :  { %207 = vmatprep.subr.mxu0 %v291_v0 }
  0x38   :  { %208 = vmatpush3.msra.mxu0 %v45_v15 }
  0x39   :  { %209 = vmatprep.subr.mxu0 %v291_v0 }
  0x3a   :  { %210 = vmatpush3.msra.mxu0 %v44_v16 }
  0x3b   :  { %212 = vmatmul.mubr.f32.vlgmr.msra.gmra.mxu0 %v43_v17 }
  0xfb   :  { %v126_v18 = vpop.f32.mrf.mxu0 }
  0xfc   :  { %v130_v19 = vmax.f32 %v126_v18, 0.0 }
  0xfd   :  { %v213_v20 = vpop.f32.mrf.mxu0 }
  0xfe   :  { %v132_v21 = vrot.slane %v130_v19, 4 }
 0x100   :  { %v133_v22 = vadd.f32 %v132_v21, %v130_v19 }
 0x102   :  { %v134_v23 = vrot.slane %v133_v22, 2 }
 0x104   :  { %v135_v24 = vadd.f32 %v134_v23, %v133_v22 }
 0x106   :  { %v136_v25 = vrot.slane %v135_v24, 1 }
 0x108   :  { %v137_v27 = vadd.f32 %v136_v25, %v135_v24 }
 0x10a   :  { %v138_v28 = vadd.f32 %v137_v27, %v131_v26 }
 0x10c   :  { %139 = vst [vmem:[#allocation2] sm:$0x1] %v138_v28 }
 0x113   :  { %v143_v29 = vld [vmem:[#allocation2] sm:$0x1] }
 0x114   :  { %v144_v30 = vmul.f32 0.125, %v143_v29 }
 0x116   :  { %145 = vst [vmem:[#allocation8] sm:$0x1] %v144_v30 }
 0x117   :  { %272 = shalt.err (!%p269_p0)
}
 0x118   :  { %155 = dma.vmem_to_hbm [thread:$0]  %s153_s1, 16, %s320_s2, [#allocation5]  }
 0x119   :  { %285 = dma.done.wait [#allocation5], 16  }
 0x11a   :  { %286 = vsyncadd [#allocation5], 4294967280 }
 0x11b   :  { %159 = vsyncpa [#allocation4], 1 }
 0x11c   :  { %160 = vsyncpa [#allocation7], 1 }
 0x11d   :  { %161 = vsyncpa [#allocation5], 1 }

</bundles_post_ra>
